<compile_context>
chip_gen: v5e
topology: v5e:2x2
jax: 0.10.0
libtpu: 0.0.40
codegen_flags: <defaults>
</compile_context>

<pallas_src>
import functools
import math

import jax
import jax.numpy as jnp
from jax import lax
from jax.experimental import pallas as pl
from jax.experimental.pallas import tpu as pltpu

_LANE = 128


def _device_kind() -> str:
    try:
        return jax.devices()[0].device_kind.lower()
    except Exception:
        return ""


def _sublane_pack(dtype) -> int:
    # Native sublane packing of a (pack, 128) tile: f32 -> 8, bf16 -> 16, int8 -> 32.
    itemsize = jnp.dtype(dtype).itemsize
    return max(8, 32 // max(1, itemsize))


def _pick_row_split(batch, n, pack):
    """Zero-copy row-split factor m (m | n): view each batch row as m rows of n//m
    elements so batch*m fills the native sublane packing (dense vregs / DMA)."""
    if batch >= pack or n <= 1:
        return 1
    want = -(-pack // batch)                      # ceil(pack / batch)
    hi = min(n, max(want * 8, 64))
    for d in range(want, hi + 1):                 # smallest divisor >= want
        if n % d == 0 and (n // d) >= _LANE:
            return d
    for d in range(want - 1, 1, -1):              # partial packing still helps
        if n % d == 0 and (n // d) >= _LANE:
            return d
    return 1


def _dice_kernel(x_ref, t_ref, inter_ref, denom_ref, *,
                 sig, compute_dtype, chunk, n_chunks,
                 tiles_per_split, num_tiles, tail_cols, mask_needed):
    """Grid = (splits ["parallel"], tiles-per-split ["arbitrary"]).

    x_ref / t_ref: (rows, block_cols) blocks in their native dtype.
    inter_ref / denom_ref: (1, rows, 128) f32 lane-wise partial sums, resident
    across the tile axis (accumulator pattern), one block per split.
    """
    sp = pl.program_id(0)          # reduction split (feeds both v7x TensorCores)
    tp = pl.program_id(1)          # column tile within the split (accumulated)
    rows = x_ref.shape[0]

    @pl.when(tp == 0)
    def _init():
        inter_ref[...] = jnp.zeros_like(inter_ref)
        denom_ref[...] = jnp.zeros_like(denom_ref)

    def accumulate(tail_limit):
        # Stream the resident (rows, block_cols) block in (rows, chunk) slices.
        # Lane-wise partial sums stay in registers (fori_loop carry); no
        # block-sized VMEM intermediates, the cross-lane fold is deferred to
        # the wrapper.  sum(x) and sum(t) are merged into sum(x + t).
        nlane = chunk // _LANE

        def body(i, carry):
            acc_i, acc_d = carry
            off = pl.multiple_of(i * chunk, chunk)
            xs = x_ref[:, pl.ds(off, chunk)].astype(compute_dtype)
            ts = t_ref[:, pl.ds(off, chunk)].astype(compute_dtype)
            if sig:
                # Single-EUP sigmoid (exact rewrite): 0.5*tanh(0.5*x) + 0.5.
                xs = jnp.tanh(xs * 0.5) * 0.5 + 0.5
            if tail_limit is not None:
                # Only ever traced/executed for the last (ragged) column tile.
                col = lax.broadcasted_iota(jnp.int32, (rows, chunk), 1) + i * chunk
                valid = col < tail_limit
                xs = jnp.where(valid, xs, 0.0)
                ts = jnp.where(valid, ts, 0.0)
            prod = xs * ts
            ssum = xs + ts
            pi = prod[:, :_LANE].astype(jnp.float32)
            pd = ssum[:, :_LANE].astype(jnp.float32)
            for c in range(1, nlane):               # fold chunk -> 128 lanes
                sl = slice(c * _LANE, (c + 1) * _LANE)
                pi = pi + prod[:, sl].astype(jnp.float32)
                pd = pd + ssum[:, sl].astype(jnp.float32)
            return acc_i + pi, acc_d + pd

        zero = jnp.zeros((rows, _LANE), jnp.float32)
        acc_i, acc_d = lax.fori_loop(0, n_chunks, body, (zero, zero))
        inter_ref[0] += acc_i
        denom_ref[0] += acc_d

    if not mask_needed:
        accumulate(None)                            # fully lane-aligned: never mask
    elif num_tiles == 1:
        accumulate(tail_cols)                       # single (partial) tile
    else:
        g = sp * tiles_per_split + tp               # global column-tile index

        @pl.when(g < num_tiles - 1)
        def _full_tiles():
            accumulate(None)                        # fast path: no mask ops

        @pl.when(g == num_tiles - 1)
        def _tail_tile():
            accumulate(tail_cols)                   # mask only the last tile


def dice_loss_batch(inputs_, targets, smooth=1.0, sig=False, *,
                    block_cols=None, num_splits=None, buffer_count=None):
    """Pallas equivalent of DiceLoss_batch.forward (returns a float32 scalar)."""
    assert inputs_.shape == targets.shape, "inputs and targets must share a shape"
    B = int(inputs_.shape[0])
    n = int(math.prod(inputs_.shape[1:]))
    assert B >= 1 and n >= 1

    kind = _device_kind()
    is_v5e = ("v5 lite" in kind) or ("v5e" in kind) or ("v5litepod" in kind)
    is_v6 = "v6" in kind

    # Compute dtype: keep 16-bit streams 16-bit through the elementwise ops
    # (accumulation is always f32); v5e has no bf16 VPU/EUP -> upconvert there.
    cdt = jnp.promote_types(inputs_.dtype, targets.dtype)
    if (not jnp.issubdtype(cdt, jnp.floating)) or jnp.dtype(cdt).itemsize >= 4 or is_v5e:
        cdt = jnp.dtype(jnp.float32)

    # Zero-copy row split (B, n) -> (rows, cols); no padding, no data movement.
    pack = max(_sublane_pack(inputs_.dtype), _sublane_pack(targets.dtype))
    m = _pick_row_split(B, n, pack)
    rows = B * m
    cols = n // m
    x2 = inputs_.reshape(rows, cols)
    t2 = targets.reshape(rows, cols)

    # Inner-loop chunk width: keep the register-carried accumulators/temps small.
    row_groups = -(-rows // 8)
    chunk = max(_LANE, ((512 // row_groups) // _LANE) * _LANE)
    chunk = min(chunk, (-(-cols // _LANE)) * _LANE)

    # Column-tile width from an explicit VMEM budget (double-buffered inputs).
    if block_cols is None:
        input_budget = (32 if is_v6 else 16) * 1024 * 1024
        col_bytes = 0
        for arr in (x2, t2):
            p = _sublane_pack(arr.dtype)
            col_bytes += (-(-rows // p) * p) * jnp.dtype(arr.dtype).itemsize
        block_cols = max(chunk, (input_budget // (2 * col_bytes)) // chunk * chunk)
    else:
        block_cols = max(chunk, (int(block_cols) // chunk) * chunk)
    block_cols = min(block_cols, (-(-cols // chunk)) * chunk)

    num_tiles = int(pl.cdiv(cols, block_cols))
    tail_cols = cols - (num_tiles - 1) * block_cols        # valid cols in last tile
    mask_needed = tail_cols != block_cols

    # Reduction split ("parallel"): both v7x TensorCores get work even for B == 1.
    if num_splits is None:
        num_splits = 2 if (num_tiles >= 4 and num_tiles % 2 == 0) else 1
    else:
        num_splits = max(1, int(num_splits))
        if num_tiles % num_splits != 0:
            num_splits = 1
    tiles_per_split = num_tiles // num_splits
    assert num_splits * tiles_per_split == num_tiles

    kernel = functools.partial(
        _dice_kernel,
        sig=bool(sig),
        compute_dtype=cdt,
        chunk=int(chunk),
        n_chunks=int(block_cols // chunk),
        tiles_per_split=int(tiles_per_split),
        num_tiles=int(num_tiles),
        tail_cols=int(tail_cols),
        mask_needed=bool(mask_needed),
    )

    def idx_in(sp, tp):
        return (0, sp * tiles_per_split + tp)

    if buffer_count:
        in_spec_x = pl.BlockSpec((rows, block_cols), idx_in,
                                 pipeline_mode=pl.Buffered(int(buffer_count)))
        in_spec_t = pl.BlockSpec((rows, block_cols), idx_in,
                                 pipeline_mode=pl.Buffered(int(buffer_count)))
    else:
        in_spec_x = pl.BlockSpec((rows, block_cols), idx_in)
        in_spec_t = pl.BlockSpec((rows, block_cols), idx_in)

    out_shape = (
        jax.ShapeDtypeStruct((num_splits, rows, _LANE), jnp.float32),
        jax.ShapeDtypeStruct((num_splits, rows, _LANE), jnp.float32),
    )
    out_specs = (
        pl.BlockSpec((1, rows, _LANE), lambda sp, tp: (sp, 0, 0)),
        pl.BlockSpec((1, rows, _LANE), lambda sp, tp: (sp, 0, 0)),
    )

    inter_p, denom_p = pl.pallas_call(
        kernel,
        out_shape=out_shape,
        grid_spec=pltpu.PrefetchScalarGridSpec(
            num_scalar_prefetch=0,
            grid=(num_splits, tiles_per_split),
            in_specs=[in_spec_x, in_spec_t],
            out_specs=out_specs,
        ),
        compiler_params=pltpu.CompilerParams(
            dimension_semantics=("parallel", "arbitrary"),
            vmem_limit_bytes=(80 if is_v6 else 48) * 1024 * 1024,
        ),
    )(x2, t2)

    # Tiny epilogue: fold splits + lanes + the m-way row split, then the
    # per-batch dice formula and the batch mean (matches torch.tensor(...).mean()).
    inter = inter_p.sum(axis=(0, 2)).reshape(B, m).sum(axis=1)
    denom = denom_p.sum(axis=(0, 2)).reshape(B, m).sum(axis=1)
    smooth = jnp.asarray(smooth, jnp.float32)
    dice = (2.0 * inter + smooth) / (denom + smooth)
    return jnp.mean(1.0 - dice)


def _reference(inputs_, targets, smooth=1.0, sig=False):
    x = inputs_.astype(jnp.float32)
    if sig:
        x = jax.nn.sigmoid(x)
    B = x.shape[0]
    xf = x.reshape(B, -1)
    tf = targets.astype(jnp.float32).reshape(B, -1)
    inter = jnp.sum(xf * tf, axis=1)
    dice = (2.0 * inter + smooth) / (jnp.sum(xf, axis=1) + jnp.sum(tf, axis=1) + smooth)
    return jnp.mean(1.0 - dice)


if __name__ == "__main__":
    key = jax.random.PRNGKey(0)
    k1, k2, k3, k4, k5 = jax.random.split(key, 5)

    # 1) Spec shapes: NCHW, B=2, C=4, H=16, W=16 (n = 1024, lane aligned).
    B, C, H, W = 2, 4, 16, 16
    probs = jax.random.uniform(k1, (B, C, H, W), dtype=jnp.float32)
    masks = (jax.random.uniform(k2, (B, C, H, W)) > 0.5).astype(jnp.float32)
    out = jax.block_until_ready(dice_loss_batch(probs, masks, smooth=1, sig=False))
    ref = _reference(probs, masks, smooth=1, sig=False)
    assert out.shape == () and out.dtype == jnp.float32
    assert jnp.allclose(out, ref, atol=1e-5, rtol=1e-5), (out, ref)

    # 2) sig=True on f32 logits (in-kernel single-EUP sigmoid).
    logits = jax.random.normal(k3, (B, C, H, W), dtype=jnp.float32)
    out_sig = jax.block_until_ready(dice_loss_batch(logits, masks, smooth=1, sig=True))
    ref_sig = _reference(logits, masks, smooth=1, sig=True)
    assert jnp.allclose(out_sig, ref_sig, atol=1e-5, rtol=1e-5), (out_sig, ref_sig)

    # 3) bf16 ragged stream (n = 3465, not a multiple of 128): no host-side pad,
    #    single partial masked tile, bf16 elementwise compute / f32 accumulation.
    C2, H2, W2 = 3, 33, 35
    logits2 = jax.random.normal(k4, (B, C2, H2, W2), dtype=jnp.bfloat16)
    masks2 = (jax.random.uniform(k2, (B, C2, H2, W2)) > 0.5).astype(jnp.bfloat16)
    out2 = jax.block_until_ready(dice_loss_batch(logits2, masks2, smooth=1, sig=True))
    ref2 = _reference(logits2, masks2, smooth=1, sig=True)
    assert jnp.allclose(out2, ref2, atol=2e-3, rtol=2e-3), (out2, ref2)

    # 4) Multi-tile accumulation + reduction split (both v7x cores) + unmasked path.
    C3, H3, W3 = 16, 64, 64
    probs3 = jax.random.uniform(k5, (B, C3, H3, W3), dtype=jnp.float32)
    masks3 = (jax.random.uniform(k1, (B, C3, H3, W3)) > 0.5).astype(jnp.float32)
    out3 = jax.block_until_ready(dice_loss_batch(probs3, masks3, smooth=1, block_cols=2048))
    ref3 = _reference(probs3, masks3, smooth=1)
    assert jnp.allclose(out3, ref3, atol=1e-5, rtol=1e-5), (out3, ref3)

    # 5) bf16 ragged with forced small tiles: split grid + mask on the last tile only.
    out4 = jax.block_until_ready(
        dice_loss_batch(logits2, masks2, smooth=1, sig=True, block_cols=128))
    assert jnp.allclose(out4, ref2, atol=2e-3, rtol=2e-3), (out4, ref2)

    # 6) B == 1: zero-copy row split still fills the sublanes (dense vregs).
    p1 = jax.random.uniform(k3, (1, C, H, W), dtype=jnp.float32)
    m1 = (jax.random.uniform(k4, (1, C, H, W)) > 0.5).astype(jnp.float32)
    out5 = jax.block_until_ready(dice_loss_batch(p1, m1, smooth=1, sig=False))
    ref5 = _reference(p1, m1, smooth=1, sig=False)
    assert jnp.allclose(out5, ref5, atol=1e-5, rtol=1e-5), (out5, ref5)

    print("KERNEL_OK")
</pallas_src>

<mosaic_0001>
module attributes {stable_mosaic.version = 11 : i64} {
  func.func @_dice_kernel(%arg0: i32, %arg1: i32, %arg2: memref<8x256xf32, #tpu.memory_space<vmem>>, %arg3: memref<8x256xf32, #tpu.memory_space<vmem>>, %arg4: memref<1x8x128xf32, #tpu.memory_space<vmem>>, %arg5: memref<1x8x128xf32, #tpu.memory_space<vmem>>) attributes {dimension_semantics = [#tpu.dimension_semantics<parallel>, #tpu.dimension_semantics<arbitrary>], iteration_bounds = array<i64: 1, 1>, scalar_prefetch = 0 : i64, scratch_operands = 0 : i64, tpu.core_type = #tpu.core_type<tc>, window_params = [{transform_indices = @transform_0, window_bounds = array<i64: 8, 256>}, {transform_indices = @transform_1, window_bounds = array<i64: 8, 256>}, {transform_indices = @transform_2, window_bounds = array<i64: 1, 8, 128>}, {transform_indices = @transform_3, window_bounds = array<i64: 1, 8, 128>}]} {
    %c0_i32 = arith.constant 0 : i32
    %0 = arith.cmpi eq, %arg1, %c0_i32 : i32
    %1 = arith.extui %0 : i1 to i32
    %c0_i32_0 = arith.constant 0 : i32
    %2 = arith.cmpi ne, %1, %c0_i32_0 : i32
    scf.if %2 {
      %cst_15 = arith.constant 0.000000e+00 : f32
      %32 = vector.broadcast %cst_15 : f32 to vector<1x8x128xf32>
      %c0_16 = arith.constant 0 : index
      %c0_17 = arith.constant 0 : index
      %c0_18 = arith.constant 0 : index
      %33 = vector.load %arg4[%c0_16, %c0_17, %c0_18] : memref<1x8x128xf32, #tpu.memory_space<vmem>>, vector<1x8x128xf32>
      tpu.vector_store %arg4[%c0_16, %c0_17, %c0_18], %32 {strides = array<i32>} : memref<1x8x128xf32, #tpu.memory_space<vmem>>, vector<1x8x128xf32>,
      %cst_19 = arith.constant 0.000000e+00 : f32
      %34 = vector.broadcast %cst_19 : f32 to vector<1x8x128xf32>
      %c0_20 = arith.constant 0 : index
      %c0_21 = arith.constant 0 : index
      %c0_22 = arith.constant 0 : index
      %35 = vector.load %arg5[%c0_20, %c0_21, %c0_22] : memref<1x8x128xf32, #tpu.memory_space<vmem>>, vector<1x8x128xf32>
      tpu.vector_store %arg5[%c0_20, %c0_21, %c0_22], %34 {strides = array<i32>} : memref<1x8x128xf32, #tpu.memory_space<vmem>>, vector<1x8x128xf32>,
    } else {
    }
    %cst = arith.constant 0.000000e+00 : f32
    %3 = vector.broadcast %cst : f32 to vector<8x128xf32>
    %c0_i32_1 = arith.constant 0 : i32
    %c256_i32 = arith.constant 256 : i32
    %4 = arith.muli %c0_i32_1, %c256_i32 : i32
    %5 = tpu.assume_multiple %4, 256 : i32
    %c0 = arith.constant 0 : index
    %6 = arith.index_cast %5 : i32 to index
    %7 = vector.load %arg2[%c0, %6] : memref<8x256xf32, #tpu.memory_space<vmem>>, vector<8x256xf32>
    %c0_2 = arith.constant 0 : index
    %8 = arith.index_cast %5 : i32 to index
    %9 = vector.load %arg3[%c0_2, %8] : memref<8x256xf32, #tpu.memory_space<vmem>>, vector<8x256xf32>
    %10 = arith.mulf %7, %9 : vector<8x256xf32>
    %11 = arith.addf %7, %9 : vector<8x256xf32>
    %12 = vector.extract_strided_slice %10 {offsets = [0, 0], sizes = [8, 128], strides = [1, 1]} : vector<8x256xf32> to vector<8x128xf32>
    %13 = vector.extract_strided_slice %11 {offsets = [0, 0], sizes = [8, 128], strides = [1, 1]} : vector<8x256xf32> to vector<8x128xf32>
    %14 = vector.extract_strided_slice %10 {offsets = [0, 128], sizes = [8, 128], strides = [1, 1]} : vector<8x256xf32> to vector<8x128xf32>
    %15 = arith.addf %12, %14 : vector<8x128xf32>
    %16 = vector.extract_strided_slice %11 {offsets = [0, 128], sizes = [8, 128], strides = [1, 1]} : vector<8x256xf32> to vector<8x128xf32>
    %17 = arith.addf %13, %16 : vector<8x128xf32>
    %18 = arith.addf %3, %15 : vector<8x128xf32>
    %19 = arith.addf %3, %17 : vector<8x128xf32>
    %c1_i32 = arith.constant 1 : i32
    %c0_3 = arith.constant 0 : index
    %c0_4 = arith.constant 0 : index
    %c0_5 = arith.constant 0 : index
    %20 = vector.load %arg4[%c0_3, %c0_4, %c0_5] : memref<1x8x128xf32, #tpu.memory_space<vmem>>, vector<1x8x128xf32>
    %21 = vector.shape_cast %20 : vector<1x8x128xf32> to vector<8x128xf32>
    %22 = arith.addf %21, %18 : vector<8x128xf32>
    %c0_6 = arith.constant 0 : index
    %c0_7 = arith.constant 0 : index
    %c0_8 = arith.constant 0 : index
    %23 = vector.load %arg4[%c0_6, %c0_7, %c0_8] : memref<1x8x128xf32, #tpu.memory_space<vmem>>, vector<1x8x128xf32>
    %24 = vector.shape_cast %23 : vector<1x8x128xf32> to vector<8x128xf32>
    %25 = vector.shape_cast %22 : vector<8x128xf32> to vector<1x8x128xf32>
    tpu.vector_store %arg4[%c0_6, %c0_7, %c0_8], %25 {strides = array<i32>} : memref<1x8x128xf32, #tpu.memory_space<vmem>>, vector<1x8x128xf32>,
    %c0_9 = arith.constant 0 : index
    %c0_10 = arith.constant 0 : index
    %c0_11 = arith.constant 0 : index
    %26 = vector.load %arg5[%c0_9, %c0_10, %c0_11] : memref<1x8x128xf32, #tpu.memory_space<vmem>>, vector<1x8x128xf32>
    %27 = vector.shape_cast %26 : vector<1x8x128xf32> to vector<8x128xf32>
    %28 = arith.addf %27, %19 : vector<8x128xf32>
    %c0_12 = arith.constant 0 : index
    %c0_13 = arith.constant 0 : index
    %c0_14 = arith.constant 0 : index
    %29 = vector.load %arg5[%c0_12, %c0_13, %c0_14] : memref<1x8x128xf32, #tpu.memory_space<vmem>>, vector<1x8x128xf32>
    %30 = vector.shape_cast %29 : vector<1x8x128xf32> to vector<8x128xf32>
    %31 = vector.shape_cast %28 : vector<8x128xf32> to vector<1x8x128xf32>
    tpu.vector_store %arg5[%c0_12, %c0_13, %c0_14], %31 {strides = array<i32>} : memref<1x8x128xf32, #tpu.memory_space<vmem>>, vector<1x8x128xf32>,
    return
  }
  func.func @transform_0(%arg0: i32, %arg1: i32) -> (i32, i32) {
    %c1_i32 = arith.constant 1 : i32
    %0 = arith.muli %arg0, %c1_i32 : i32
    %1 = arith.addi %0, %arg1 : i32
    %c0_i32 = arith.constant 0 : i32
    %c0_i32_0 = arith.constant 0 : i32
    return %c0_i32, %1 : i32, i32
  }
  func.func @transform_1(%arg0: i32, %arg1: i32) -> (i32, i32) {
    %c1_i32 = arith.constant 1 : i32
    %0 = arith.muli %arg0, %c1_i32 : i32
    %1 = arith.addi %0, %arg1 : i32
    %c0_i32 = arith.constant 0 : i32
    %c0_i32_0 = arith.constant 0 : i32
    return %c0_i32, %1 : i32, i32
  }
  func.func @transform_2(%arg0: i32, %arg1: i32) -> (i32, i32, i32) {
    %c0_i32 = arith.constant 0 : i32
    %c0_i32_0 = arith.constant 0 : i32
    %c0_i32_1 = arith.constant 0 : i32
    return %arg0, %c0_i32, %c0_i32_0 : i32, i32, i32
  }
  func.func @transform_3(%arg0: i32, %arg1: i32) -> (i32, i32, i32) {
    %c0_i32 = arith.constant 0 : i32
    %c0_i32_0 = arith.constant 0 : i32
    %c0_i32_1 = arith.constant 0 : i32
    return %arg0, %c0_i32, %c0_i32_0 : i32, i32, i32
  }
}

</mosaic_0001>

<bundles_post_ra>
// kernel: tpu_custom_call.1
= control target key start
LH: loop header
LB: loop body
LE: loop exit
PB: predicated region body
PF: predicated region fallthrough
CT: control target
= control target key end

     0   :  { %9 = vsyncpa [#allocation3], 0  ;;  %s258_s0 = inlined_call_operand.hbm [shape: f32[8,256], index: 0, kind: input, shape index: {}]   ;;  %s259_s1 = inlined_call_operand.hbm [shape: f32[8,256], index: 1, kind: input, shape index: {}]   ;;  %s260_s2 = inlined_call_operand.hbm [shape: f32[1,8,128], index: 2, kind: output, shape index: {0}]   ;;  %s261_s3 = inlined_call_operand.hbm [shape: f32[1,8,128], index: 3, kind: output, shape index: {1}]  }
   0x1   :  { %10 = vsyncpa [#allocation6], 0 }
   0x2   :  { %11 = vsyncpa [#allocation4], 0 }
   0x3   :  { %12 = vsyncpa [#allocation9], 0  ;;  %s22_s14 = sshll.u32 %s258_s0, 4  ;;  %s222_s15 = smov [#allocation2]   ;;  %s23_s14 = int_to_ptr.hbm [resolvable:$true] %s22_s14 }
   0x4   :  { %s24_s16 = sshll.u32 %s222_s15, 4  ;;  %s37_s19 = sshll.u32 %s259_s1, 4  ;;  %s25_s16 = int_to_ptr.vmem [resolvable:$true] %s24_s16  ;;  %s38_s19 = int_to_ptr.hbm [resolvable:$true] %s37_s19 }
   0x5   :  { %27 = dma.hbm_to_vmem [thread:$0]  %s23_s14, 256, %s25_s16, [#allocation3]  }
   0x6   :  { %s223_s20 = smov [#allocation5]  }
   0x7   :  { %s39_s21 = sshll.u32 %s223_s20, 4  ;;  %s40_s21 = int_to_ptr.vmem [resolvable:$true] %s39_s21 }
   0x8   :  { %42 = dma.hbm_to_vmem [thread:$0]  %s38_s19, 256, %s40_s21, [#allocation6]  }
   0x9   :  { %214 = dma.done.wait [#allocation3], 256  }
   0xa   :  { %215 = vsyncadd [#allocation3], 4294967040 }
   0xb   :  { %216 = dma.done.wait [#allocation6], 256  }
   0xc   :  { %217 = vsyncadd [#allocation6], 4294967040  ;;  %v61_v0 = vld [vmem:[#allocation2] sm:$0xff]  ;;  %v62_v1 = vld [vmem:[#allocation2 + $0x8] sm:$0xff]  ;;  %s224_s0 = smov [#allocation7]   ;;  %s86_s24 = sshll.u32 %s260_s2, 4  ;;  %s87_s24 = int_to_ptr.hbm [resolvable:$true] %s86_s24 }
   0xd   :  { %v63_v2 = vld [vmem:[#allocation5] sm:$0xff]  ;;  %v64_v3 = vld [vmem:[#allocation5 + $0x8] sm:$0xff]  ;;  %s84_s1 = sshll.u32 %s224_s0, 4  ;;  %s225_s25 = smov [#allocation8]   ;;  %s85_s1 = int_to_ptr.vmem [resolvable:$true] %s84_s1 }
   0xe   :  { %v65_v4 = vmul.f32 %v63_v2, %v61_v0  ;;  %v67_v5 = vadd.f32 %v63_v2, %v61_v0  ;;  %v66_v6 = vmul.f32 %v64_v3, %v62_v1  ;;  %v68_v7 = vadd.f32 %v64_v3, %v62_v1  ;;  %s95_s26 = sshll.u32 %s225_s25, 4  ;;  %s97_s29 = sshll.u32 %s261_s3, 4  ;;  %s96_s26 = int_to_ptr.vmem [resolvable:$true] %s95_s26  ;;  %s98_s29 = int_to_ptr.hbm [resolvable:$true] %s97_s29 }
  0x10   :  { %v69_v8 = vadd.f32 %v66_v6, %v65_v4  ;;  %v70_v9 = vadd.f32 %v68_v7, %v67_v5 }
  0x12   :  { %75 = vst [vmem:[#allocation7] sm:$0xff] %v69_v8 }
  0x13   :  { %78 = vst [vmem:[#allocation8] sm:$0xff] %v70_v9  ;;  %89 = dma.vmem_to_hbm [thread:$0]  %s85_s1, 128, %s87_s24, [#allocation4]  }
  0x14   :  { %100 = dma.vmem_to_hbm [thread:$0]  %s96_s26, 128, %s98_s29, [#allocation9]  }
  0x15   :  { %218 = dma.done.wait [#allocation4], 128  }
  0x16   :  { %219 = vsyncadd [#allocation4], 4294967168 }
  0x17   :  { %220 = dma.done.wait [#allocation9], 128  }
  0x18   :  { %221 = vsyncadd [#allocation9], 4294967168 }
  0x19   :  { %109 = vsyncpa [#allocation3], 1 }
  0x1a   :  { %110 = vsyncpa [#allocation6], 1 }
  0x1b   :  { %111 = vsyncpa [#allocation4], 1 }
  0x1c   :  { %112 = vsyncpa [#allocation9], 1 }

</bundles_post_ra>
